<compile_context>
chip_gen: v7x
topology: tpu7x:2x2x1
jax: 0.10.0
libtpu: 0.0.40
codegen_flags: <defaults>
</compile_context>

<pallas_src>
import numpy as np
import jax
import jax.numpy as jnp
from jax.experimental import pallas as pl
from jax.experimental.pallas import tpu as pltpu

_MEL_BREAK_FREQUENCY_HERTZ = 700.0
_MEL_HIGH_FREQUENCY_Q = 1127.0


def _round_up(x, m):
    return ((x + m - 1) // m) * m


def _spectral_mats(window_length, n_mels, sample_rate):
    """cos/sin DFT matrices at mel-spaced frequencies (matches get_spectral_matrix)."""
    upper_hz = sample_rate / 2
    lower_hz = sample_rate / window_length
    upper_mel = _MEL_HIGH_FREQUENCY_Q * np.log1p(upper_hz / _MEL_BREAK_FREQUENCY_HERTZ)
    lower_mel = _MEL_HIGH_FREQUENCY_Q * np.log1p(lower_hz / _MEL_BREAK_FREQUENCY_HERTZ)
    mel_freqs = np.linspace(lower_mel, upper_mel, n_mels, dtype=np.float64)
    hz_freqs = _MEL_BREAK_FREQUENCY_HERTZ * np.expm1(mel_freqs / _MEL_HIGH_FREQUENCY_Q)
    t = 2.0 * np.pi / sample_rate * np.arange(window_length, dtype=np.float64)
    tmat = t[:, None] * hz_freqs[None, :]          # (W, n_mels)
    # reference imag part uses -sin; sign is irrelevant for the magnitude output
    return np.cos(tmat), np.sin(tmat)


# ------------------------------- Pallas kernel --------------------------------
def _mel_dft_kernel(frames_ref, basis_ref, out_ref):
    # frames_ref: (1, W, F_TILE)  float32       (frames on the lane axis)
    # basis_ref : (2*n_mels, W)   float32|bf16  (window-folded [cos; sin] bases)
    # out_ref   : (1, n_mels, F_TILE) float32
    n_mels = out_ref.shape[1]
    basis = basis_ref[...]
    frames = frames_ref[0]
    if basis.dtype == jnp.bfloat16:
        frames = frames.astype(jnp.bfloat16)
    ri = jnp.dot(basis, frames, preferred_element_type=jnp.float32)  # (2*n_mels, F_TILE)
    re = ri[:n_mels]
    im = ri[n_mels:]
    # reference applies no eps floor: sqrt(re^2 + im^2) exactly (f32 VPU/EUP path)
    out_ref[0] = jnp.sqrt(re * re + im * im)


# --------------------------------- Wrapper ------------------------------------
class MelDFTSpectrogramPallas:
    def __init__(self, window_length, hop_size, n_mels=64, sample_rate=16000,
                 frame_tile=512, use_bf16_matmul=False):
        self.window_length = int(window_length)
        self.hop_size = int(hop_size)
        self.n_mels = int(n_mels)
        self.frame_tile = _round_up(int(frame_tile), 128)

        cos_mat, sin_mat = _spectral_mats(self.window_length, self.n_mels, sample_rate)

        # torch.hann_window default: periodic Hann
        n = np.arange(self.window_length, dtype=np.float64)
        hann = 0.5 - 0.5 * np.cos(2.0 * np.pi * n / self.window_length)

        # Fold the window into the bases and fuse [cos; sin] -> (2*n_mels, W).
        wcos = (hann[:, None] * cos_mat).T          # (n_mels, W)
        wsin = (hann[:, None] * sin_mat).T          # (n_mels, W)
        basis = np.concatenate([wcos, wsin], axis=0).astype(np.float32)  # (2*n_mels, W)
        if use_bf16_matmul:
            # native-MXU path on v6e/v7x; ~1e-3 relative error in the spectrogram
            self.basis = jnp.asarray(basis, dtype=jnp.bfloat16)
        else:
            self.basis = jnp.asarray(basis)

    def __call__(self, x):
        shape = x.shape
        T = shape[-1]
        W, H, M = self.window_length, self.hop_size, self.n_mels
        x2 = x.reshape(-1, T).astype(jnp.float32)   # (B, T)
        B = x2.shape[0]

        # F.conv1d with stride=hop, no padding
        n_frames = (T - W) // H + 1
        assert n_frames >= 1, "input shorter than window_length"

        f_tile = min(self.frame_tile, _round_up(n_frames, 128))   # multiple of 128
        n_frames_pad = _round_up(n_frames, f_tile)

        # Frame the signal transposed: frames_t[b, m, f] = x[b, f*H + m].
        # (XLA gather; ~W/H x input duplication in HBM. Replacing it with an
        #  in-kernel pl.ANY + manual-DMA framing of the raw signal would cut
        #  input HBM traffic further but hop is not lane-aligned; kept as glue.)
        need = (n_frames_pad - 1) * H + W
        x_pad = jnp.pad(x2, ((0, 0), (0, max(0, need - T))))
        idx_t = (np.arange(W, dtype=np.int32)[:, None]
                 + H * np.arange(n_frames_pad, dtype=np.int32)[None, :])
        frames_t = x_pad[:, idx_t]                  # (B, W, n_frames_pad)

        grid = (B, n_frames_pad // f_tile)
        out = pl.pallas_call(
            _mel_dft_kernel,
            out_shape=jax.ShapeDtypeStruct((B, M, n_frames_pad), jnp.float32),
            grid=grid,
            in_specs=[
                pl.BlockSpec((1, W, f_tile), lambda b, t: (b, 0, t)),
                pl.BlockSpec((2 * M, W), lambda b, t: (0, 0)),
            ],
            out_specs=pl.BlockSpec((1, M, f_tile), lambda b, t: (b, 0, t)),
            compiler_params=pltpu.CompilerParams(
                dimension_semantics=("parallel", "parallel")),
        )(frames_t, self.basis)

        out = out[:, :, :n_frames]                  # drop frame-tile padding
        return out.reshape(*shape[:-1], M, n_frames)


if __name__ == "__main__":
    key = jax.random.PRNGKey(0)
    B, T = 2, 2048
    window_length, hop_size, n_mels, sample_rate = 256, 64, 64, 16000

    x = jax.random.normal(key, (B, T), dtype=jnp.float32)
    mod = MelDFTSpectrogramPallas(window_length, hop_size, n_mels, sample_rate)

    y = mod(x)
    jax.block_until_ready(y)

    n_frames = (T - window_length) // hop_size + 1
    assert y.shape == (B, n_mels, n_frames), y.shape
    assert y.dtype == jnp.float32
    assert bool(jnp.all(jnp.isfinite(y)))

    # float64 numpy reference mirroring the PyTorch forward
    x_np = np.asarray(x, dtype=np.float64)
    hann = 0.5 - 0.5 * np.cos(2.0 * np.pi * np.arange(window_length) / window_length)
    cos_m, sin_m = _spectral_mats(window_length, n_mels, sample_rate)
    fr = np.stack(
        [x_np[:, f * hop_size:f * hop_size + window_length] for f in range(n_frames)],
        axis=1) * hann[None, None, :]                         # (B, F, W)
    ref = np.sqrt((fr @ cos_m) ** 2 + (fr @ (-sin_m)) ** 2).transpose(0, 2, 1)
    rel_err = np.max(np.abs(np.asarray(y, np.float64) - ref)) / np.max(np.abs(ref))
    assert rel_err < 2e-2, rel_err

    print("KERNEL_OK")
</pallas_src>

<mosaic_0001>
module attributes {stable_mosaic.version = 11 : i64} {
  func.func @_mel_dft_kernel(%arg0: i32, %arg1: i32, %arg2: memref<1x256x128xf32, #tpu.memory_space<vmem>>, %arg3: memref<128x256xf32, #tpu.memory_space<vmem>>, %arg4: memref<1x64x128xf32, #tpu.memory_space<vmem>>) attributes {dimension_semantics = [#tpu.dimension_semantics<parallel>, #tpu.dimension_semantics<parallel>], iteration_bounds = array<i64: 2, 1>, scalar_prefetch = 0 : i64, scratch_operands = 0 : i64, tpu.core_type = #tpu.core_type<tc>, window_params = [{transform_indices = @transform_0, window_bounds = array<i64: 1, 256, 128>}, {pipeline_mode = #tpu.pipeline_mode<synchronous>, transform_indices = @transform_1, window_bounds = array<i64: 128, 256>}, {transform_indices = @transform_2, window_bounds = array<i64: 1, 64, 128>}]} {
    %c0 = arith.constant 0 : index
    %c0_0 = arith.constant 0 : index
    %0 = vector.load %arg3[%c0, %c0_0] : memref<128x256xf32, #tpu.memory_space<vmem>>, vector<128x256xf32>
    %c0_1 = arith.constant 0 : index
    %c0_2 = arith.constant 0 : index
    %c0_3 = arith.constant 0 : index
    %1 = vector.load %arg2[%c0_1, %c0_2, %c0_3] : memref<1x256x128xf32, #tpu.memory_space<vmem>>, vector<1x256x128xf32>
    %2 = vector.shape_cast %1 : vector<1x256x128xf32> to vector<256x128xf32>
    %cst = arith.constant dense<0.000000e+00> : vector<128x128xf32>
    %3 = tpu.matmul %0, %2, %cst {dimension_numbers = #tpu.dot_dimension_numbers<[1], [0], [0], [1], [0, 0, 1, 1], [], []>} : vector<128x256xf32>, vector<256x128xf32>, vector<128x128xf32> -> vector<128x128xf32>
    %4 = vector.extract_strided_slice %3 {offsets = [0, 0], sizes = [64, 128], strides = [1, 1]} : vector<128x128xf32> to vector<64x128xf32>
    %5 = vector.extract_strided_slice %3 {offsets = [64, 0], sizes = [64, 128], strides = [1, 1]} : vector<128x128xf32> to vector<64x128xf32>
    %6 = arith.mulf %4, %4 : vector<64x128xf32>
    %7 = arith.mulf %5, %5 : vector<64x128xf32>
    %8 = arith.addf %6, %7 : vector<64x128xf32>
    %9 = math.sqrt %8 : vector<64x128xf32>
    %c0_4 = arith.constant 0 : index
    %c0_5 = arith.constant 0 : index
    %c0_6 = arith.constant 0 : index
    %10 = vector.load %arg4[%c0_4, %c0_5, %c0_6] : memref<1x64x128xf32, #tpu.memory_space<vmem>>, vector<1x64x128xf32>
    %11 = vector.shape_cast %10 : vector<1x64x128xf32> to vector<64x128xf32>
    %12 = vector.shape_cast %9 : vector<64x128xf32> to vector<1x64x128xf32>
    tpu.vector_store %arg4[%c0_4, %c0_5, %c0_6], %12 {strides = array<i32>} : memref<1x64x128xf32, #tpu.memory_space<vmem>>, vector<1x64x128xf32>,
    return
  }
  func.func @transform_0(%arg0: i32, %arg1: i32) -> (i32, i32, i32) {
    %c0_i32 = arith.constant 0 : i32
    %c0_i32_0 = arith.constant 0 : i32
    return %arg0, %c0_i32, %arg1 : i32, i32, i32
  }
  func.func @transform_1(%arg0: i32, %arg1: i32) -> (i32, i32) {
    %c0_i32 = arith.constant 0 : i32
    %c0_i32_0 = arith.constant 0 : i32
    %c0_i32_1 = arith.constant 0 : i32
    return %c0_i32, %c0_i32_0 : i32, i32
  }
  func.func @transform_2(%arg0: i32, %arg1: i32) -> (i32, i32, i32) {
    %c0_i32 = arith.constant 0 : i32
    %c0_i32_0 = arith.constant 0 : i32
    return %arg0, %c0_i32, %arg1 : i32, i32, i32
  }
}

</mosaic_0001>

<bundles_post_ra>
// kernel: tpu_custom_call.1
= control target key start
LH: loop header
LB: loop body
LE: loop exit
PB: predicated region body
PF: predicated region fallthrough
CT: control target
= control target key end

     0   :  { %7 = vsyncpa [#allocation3], 0  ;;  %s1294_s0 = inlined_call_operand.hbm [shape: f32[2,256,128], index: 0, kind: input, shape index: {}]   ;;  %s1295_s1 = inlined_call_operand.hbm [shape: f32[128,256], index: 1, kind: input, shape index: {}]   ;;  %s1296_s2 = inlined_call_operand.hbm [shape: f32[2,64,128], index: 2, kind: output, shape index: {}]  }
   0x1   :  { %9 = vsyncpa [#allocation3 + $0x1], 0 }
   0x2   :  { %10 = vsyncpa [#allocation6], 0 }
   0x3   :  { %11 = vsyncpa [#allocation4], 0 }
   0x4   :  { %13 = vsyncpa [#allocation4 + $0x1], 0  ;;  %s1013_s9 = smov 0   ;;  %s1015_s10 = smov 0  }
   0x5   :  { %s1017_s11 = smov 0   ;;  %s1019_s12 = smov 0  }
   0x6   :  { %s1021_s13 = smov 0   ;;  %s1023_s14 = smov 0  }
   0x7 LB: > { %s601_s15 = sadd.s32 4294967295, %s987_s14   ;;  %s602_s16 = sadd.s32 4294967294, %s987_s14   ;;  %s987_s14 = sphi %s1023_s14, %s19_s14   ;;  %s983_s13 = sphi %s1021_s13, %s1320_s13   ;;  %s979_s12 = sphi %s1019_s12, %s1319_s12   ;;  %s975_s11 = sphi %s1017_s11, %s1318_s11   ;;  %s971_s10 = sphi %s1015_s10, %s1317_s10   ;;  %s967_s9 = sphi %s1013_s9, %s1316_s9  }
   0x8   : > { %p53_p0 = scmp.ne.s32.totalorder %s971_s10, %s967_s9  ;;  %p1047_p1 = scmp.eq.s32.totalorder %s601_s15, 0 }
   0x9   : > { %p1051_p2 = scmp.eq.s32.totalorder %s601_s15, 1  ;;  %p106_p3 = scmp.eq.s32.totalorder %s602_s16, 1 }
   0xa   : > { %s1301_s17 = scalar_select %p1047_p1, 1, 0 }
   0xb   : > { %s1302_s18 = scalar_select %p1051_p2, 1, 0 }
   0xc   : > { %p1057_p4 = por %p1047_p1, %p53_p0  ;;  %p603_p5 = scmp.ge.s32.totalorder %s987_s14, 1 }
   0xd   : > { %p1062_p6 = por %p106_p3, %p53_p0  ;;  %p113_p7 = scmp.lt.s32.totalorder %s987_s14, 3 }
   0xe   : > { %s1303_s19 = scalar_select %p1057_p4, 1, 0 }
   0xf   : > { %s1304_s20 = scalar_select %p1062_p6, 1, 0 }
  0x10   : > { %p1067_p8 = pnand %p603_p5, %p113_p7  ;;  %s989_s22 = smov [#allocation5]  }
  0x11   : > { %s125_s23 = sshll.u32 %s989_s22, 4  ;;  %s31_s25 = sadd.s32 1, %s983_s13  ;;  %s126_s23 = int_to_ptr.vmem [resolvable:$true] %s125_s23 }
  0x12   : > { %s1305_s21 = scalar_select %p1067_p8, 1, 0 }
  0x13   : > { %p756_p9 = pneg %p1067_p8  ;;  %s843_s28 = scalar_lea.hbm %s1295_s1, 4096 }
  0x14   : > { %p844_p12 = scmp.ne.s32.totalorder %s1295_s1, %s843_s28  ;;  %p850_p5 = scmp.lt.u32.totalorder %s843_s28, %s1295_s1 }
  0x15   : > { %p1076_p11 = pnand %p756_p9, %p1047_p1 }
  0x17   : > { %p845_p13 = pneg %p1076_p11 }
  0x19   : > { %p846_p0 = pnand %p845_p13, %p844_p12 }
  0x1b   : > { %p847_p3 = pneg %p846_p0 }
  0x1d   : > { %p852_p7 = pnand %p850_p5, %p847_p3 }
  0x1f   : > { %855 = shalt.err (!%p852_p7)
}
  0x20   : > { %s856_s5 = scalar_lea.vmem %s126_s23, 4096  ;;  %p864_p1 = scmp.lt.s32.totalorder %s126_s23, %s126_s23 }
  0x21   : > { %p857_p9 = scmp.ne.s32.totalorder %s126_s23, %s856_s5  ;;  %p865_p4 = scmp.lt.s32.totalorder %s856_s5, %s856_s5 }
  0x23   : > { %p859_p10 = pnand %p857_p9, %p845_p13  ;;  %p866_p8 = por %p865_p4, %p864_p1 }
  0x25   : > { %p860_p6 = pneg %p859_p10 }
  0x27   : > { %p867_p2 = pnand %p866_p8, %p860_p6 }
  0x29   : > { %870 = shalt.err (!%p867_p2)
}
  0x2a   : > { %s990_s6 = smov 256   ;;  %s991_s7 = smov 16  }
  0x2b   : > { %759 = dma.hbm_to_vmem [thread:$0]  (!%p1076_p11), %s1295_s1, 4096, %s126_s23, [#allocation6], %s990_s6, %s990_s6, %s991_s7  }
  0x2c   : > { %p33_p1 = scmp.ge.s32.totalorder %s31_s25, 2  ;;  %s40_s16 = sadd.s32 1, %s975_s11 }
  0x2d   : > { %p47_p2 = scmp.ne.s32.totalorder %s975_s11, %s971_s10  ;;  %p48_p4 = scmp.eq.s32.totalorder %s987_s14, 0 }
  0x2e   : > { %s1322_s25 = smov (%p33_p1, %s31_s25), 0  ;;  %p1308_p8 = scmp.ne.s32.totalorder %s1302_s18, 0 }
  0x2f   : > { %p1103_p6 = por %p48_p4, %p47_p2  ;;  %s35_s24 = ssub.s32 %s983_s13, %s1322_s25 }
  0x30   : > { %p1109_p10 = por %p1308_p8, %p47_p2  ;;  %p769_p12 = scmp.lt.s32.totalorder %s987_s14, 2 }
  0x31   : > { %p38_p11 = scmp.eq.s32.totalorder %s35_s24, 0  ;;  %s139_s23 = sand.u32 1, %s975_s11  }
  0x32   : > { %s606_s27 = sshll.u32 %s139_s23, 8  ;;  %s618_s29 = sshll.u32 %s983_s13, 12 }
  0x33   : > { %s1118_s28 = scalar_select %p38_p11, %s975_s11, %s40_s16  }
  0x34   : > { %s1124_s4 = scalar_lea.hbm %s1294_s0, %s618_s29  ;;  %s143_s18 = scalar_lea.vmem [#allocation2], %s606_s27 }
  0x35   : > { %s151_s5 = sshll.u32 %s143_s18, 4  ;;  %p1130_p13 = pnand %p769_p12, %p1103_p6  ;;  %s1126_s5 = int_to_ptr.vmem [resolvable:$true] %s151_s5 }
  0x36   : > { %s1134_s7 = scalar_lea.sflag [#allocation3], %s139_s23  ;;  %s871_s8 = scalar_lea.hbm %s1124_s4, 4096 }
  0x37   : > { %p872_p0 = scmp.ne.s32.totalorder %s1124_s4, %s871_s8  ;;  %p873_p3 = pneg %p1130_p13 }
  0x38   : > { %s876_s22 = scalar_lea.hbm %s1294_s0, 8192  ;;  %p877_p9 = scmp.lt.u32.totalorder %s1124_s4, %s1294_s0 }
  0x39   : > { %p874_p5 = pnand %p873_p3, %p872_p0  ;;  %p878_p1 = scmp.lt.u32.totalorder %s876_s22, %s871_s8 }
  0x3a   : > { %p880_p4 = scmp.lt.u32.totalorder %s871_s8, %s1124_s4 }
  0x3b   : > { %p875_p7 = pneg %p874_p5  ;;  %p879_p2 = por %p878_p1, %p877_p9 }
  0x3d   : > { %p881_p6 = por %p880_p4, %p879_p2 }
  0x3f   : > { %p882_p8 = pnand %p881_p6, %p875_p7 }
  0x41   : > { %885 = shalt.err (!%p882_p8)
}
  0x42   : > { %s886_s23 = scalar_lea.vmem %s1126_s5, 4096  ;;  %s992_s29 = smov [#allocation2]  }
  0x43   : > { %p887_p12 = scmp.ne.s32.totalorder %s1126_s5, %s886_s23  ;;  %s891_s30 = sshll.u32 %s992_s29, 4  ;;  %s892_s30 = int_to_ptr.vmem [resolvable:$false] %s891_s30 }
  0x44   : > { %s893_s3 = scalar_lea.vmem %s892_s30, 8192  ;;  %p894_p5 = scmp.lt.s32.totalorder %s1126_s5, %s892_s30 }
  0x45   : > { %p889_p11 = pnand %p887_p12, %p873_p3  ;;  %p895_p9 = scmp.lt.s32.totalorder %s893_s3, %s886_s23 }
  0x47   : > { %p890_p0 = pneg %p889_p11  ;;  %p896_p1 = por %p895_p9, %p894_p5 }
  0x49   : > { %p897_p2 = pnand %p896_p1, %p890_p0 }
  0x4b   : > { %900 = shalt.err (!%p897_p2)
}
  0x4c   : > { %s993_s18 = smov 128   ;;  %s994_s8 = smov 8  }
  0x4d   : > { %763 = dma.hbm_to_vmem [thread:$0]  (!%p1130_p13), %s1124_s4, 4096, %s1126_s5, %s1134_s7, %s993_s18, %s993_s18, %s994_s8  }
  0x4e   : > { %p1311_p3 = scmp.ne.s32.totalorder %s1305_s21, 0 }
  0x4f   : > { %s1165_s15 = sand.u32 (!%p1311_p3), 1, %s971_s10   ;;  %p1312_p7 = scmp.ne.s32.totalorder (!%p1311_p3), %s1303_s19, 0 }
  0x50   : > { %163 = sbr.rel (%p1311_p3) target bundleno = 403 (0x193), region = 28  ;;  %s610_s16 = sshll.u32 (!%p1311_p3), %s1165_s15, 8 }
  0x51   : > { %s166_s22 = scalar_lea.sflag (!%p1311_p3), [#allocation3], %s1165_s15  ;;  %s1169_s24 = scalar_lea.vmem (!%p1311_p3), [#allocation2], %s610_s16 }
  0x57   : > { %954 = dma.done.wait (%p1312_p7), %s166_s22, 4096  }
  0x58   : > { %956 = vsyncadd (%p1312_p7), %s166_s22, 4294963200  ;;  %p1313_p13 = scmp.ne.s32.totalorder %s1301_s17, 0 }
  0x5a   : > { %958 = dma.done.wait (%p1313_p13), [#allocation6], 4096  }
  0x5b   : > { %960 = vsyncadd (%p1313_p13), [#allocation6], 4294963200  ;;  %v242_v0 = vld [vmem:[%s1169_s24 + $0x80] sm:$0xff]  ;;  %v243_v1 = vld [vmem:[%s1169_s24 + $0x88] sm:$0xff]  ;;  %s612_s17 = sshll.u32 %s1165_s15, 6  ;;  %s619_s21 = sshll.u32 %s979_s12, 10 }
  0x5c   : > { %v226_v2 = vld [vmem:[%s1169_s24] sm:$0xff]  ;;  %v700_v3 = vpack.c.bf16 %v243_v1, %v242_v0  ;;  %v227_v4 = vld [vmem:[%s1169_s24 + $0x8] sm:$0xff]  ;;  %v244_v5 = vld [vmem:[%s1169_s24 + $0x90] sm:$0xff]  ;;  %s1218_s19 = scalar_lea.vmem [#allocation7], %s612_s17  ;;  %s1242_s7 = scalar_lea.hbm %s1296_s2, %s619_s21 }
  0x5d   : > { %v245_v6 = vld [vmem:[%s1169_s24 + $0x98] sm:$0xff]  ;;  %v702_v7 = vpack.c.bf16 %v227_v4, %v226_v2  ;;  %v228_v9 = vld [vmem:[%s1169_s24 + $0x10] sm:$0xff]  ;;  %v246_v11 = vld [vmem:[%s1169_s24 + $0xa0] sm:$0xff]  ;;  %s506_s4 = sshll.u32 %s1218_s19, 4  ;;  %s492_s12 = scalar_lea.sflag [#allocation4], %s1165_s15  ;;  %s1244_s4 = int_to_ptr.vmem [resolvable:$true] %s506_s4 }
  0x5e   : > { %v704_v8 = vpack.c.bf16 %v245_v6, %v244_v5  ;;  %v229_v10 = vld [vmem:[%s1169_s24 + $0x18] sm:$0xff]  ;;  %701 = vmatprep.subr.bf16.mxu0 %v700_v3  ;;  %732 = vmatprep.subr.bf16.mxu1 %v700_v3  ;;  %v247_v12 = vld [vmem:[%s1169_s24 + $0xa8] sm:$0xff]  ;;  %v230_v15 = vld [vmem:[%s1169_s24 + $0x20] sm:$0xff]  ;;  %s901_s27 = scalar_lea.vmem %s1244_s4, 1024  ;;  %s995_s23 = smov [#allocation7]  }
  0x5f   : > { %703 = vmatpush3.bf16.msra.mxu0 %v702_v7  ;;  %740 = vmatpush3.bf16.msra.mxu1 %v702_v7  ;;  %v706_v13 = vpack.c.bf16 %v229_v10, %v228_v9  ;;  %v708_v14 = vpack.c.bf16 %v247_v12, %v246_v11  ;;  %v231_v16 = vld [vmem:[%s1169_s24 + $0x28] sm:$0xff]  ;;  %v248_v17 = vld [vmem:[%s1169_s24 + $0xb0] sm:$0xff]  ;;  %v249_v18 = vld [vmem:[%s1169_s24 + $0xb8] sm:$0xff]  ;;  %p902_p4 = scmp.ne.s32.totalorder %s1244_s4, %s901_s27  ;;  %s905_s29 = sshll.u32 %s995_s23, 4  ;;  %s906_s29 = int_to_ptr.vmem [resolvable:$false] %s905_s29 }
  0x60   : > { %705 = vmatprep.subr.bf16.mxu0 %v704_v8  ;;  %733 = vmatprep.subr.bf16.mxu1 %v704_v8  ;;  %v710_v19 = vpack.c.bf16 %v231_v16, %v230_v15  ;;  %v712_v20 = vpack.c.bf16 %v249_v18, %v248_v17  ;;  %v232_v21 = vld [vmem:[%s1169_s24 + $0x30] sm:$0xff]  ;;  %v233_v22 = vld [vmem:[%s1169_s24 + $0x38] sm:$0xff]  ;;  %v250_v23 = vld [vmem:[%s1169_s24 + $0xc0] sm:$0xff]  ;;  %s907_s30 = scalar_lea.vmem %s906_s29, 2048  ;;  %p908_p12 = scmp.lt.s32.totalorder %s1244_s4, %s906_s29 }
  0x61   : > { %v251_v24 = vld [vmem:[%s1169_s24 + $0xc8] sm:$0xff]  ;;  %v714_v27 = vpack.c.bf16 %v233_v22, %v232_v21  ;;  %v234_v29 = vld [vmem:[%s1169_s24 + $0x40] sm:$0xff]  ;;  %v252_v31 = vld [vmem:[%s1169_s24 + $0xd0] sm:$0xff]  ;;  %p903_p6 = pnand %p902_p4, %p1109_p10  ;;  %p909_p11 = scmp.lt.s32.totalorder %s907_s30, %s901_s27 }
  0x62   : > { %v195_v25 = vld [vmem:[#allocation5 + $0x8] sm:$0xff]  ;;  %v716_v28 = vpack.c.bf16 %v251_v24, %v250_v23  ;;  %v253_v32 = vld [vmem:[%s1169_s24 + $0xd8] sm:$0xff]  ;;  %v236_v35 = vld [vmem:[%s1169_s24 + $0x50] sm:$0xff] }
  0x63   : > { %707 = vmatpush3.bf16.msra.mxu0 %v706_v13  ;;  %741 = vmatpush3.bf16.msra.mxu1 %v706_v13  ;;  %v211_v26 = vld [vmem:[#allocation5 + $0x88] sm:$0xff]  ;;  %v720_v34 = vpack.c.bf16 %v253_v32, %v252_v31  ;;  %v237_v36 = vld [vmem:[%s1169_s24 + $0x58] sm:$0xff]  ;;  %v254_v37 = vld [vmem:[%s1169_s24 + $0xe0] sm:$0xff]  ;;  %p904_p8 = pneg %p903_p6  ;;  %p910_p0 = por %p909_p11, %p908_p12 }
  0x64   : > { %709 = vmatprep.subr.bf16.mxu0 %v708_v14  ;;  %734 = vmatprep.subr.bf16.mxu1 %v708_v14  ;;  %v235_v30 = vld [vmem:[%s1169_s24 + $0x48] sm:$0xff]  ;;  %v722_v39 = vpack.c.bf16 %v237_v36, %v236_v35  ;;  %v238_v41 = vld [vmem:[%s1169_s24 + $0x60] sm:$0xff]  ;;  %v256_v43 = vld [vmem:[%s1169_s24 + $0xf0] sm:$0xff] }
  0x65   : > { %322 = vmatprep.mubr.f32.mxu0 %v195_v25  ;;  %362 = vmatprep.mubr.f32.mxu1 %v211_v26  ;;  %v718_v33 = vpack.c.bf16 %v235_v30, %v234_v29  ;;  %v255_v38 = vld [vmem:[%s1169_s24 + $0xe8] sm:$0xff]  ;;  %v257_v44 = vld [vmem:[%s1169_s24 + $0xf8] sm:$0xff]  ;;  %v240_v47 = vld [vmem:[%s1169_s24 + $0x70] sm:$0xff]  ;;  %p911_p5 = pnand %p910_p0, %p904_p8 }
  0x66   : > { %v724_v40 = vpack.c.bf16 %v255_v38, %v254_v37  ;;  %v239_v42 = vld [vmem:[%s1169_s24 + $0x68] sm:$0xff]  ;;  %v728_v46 = vpack.c.bf16 %v257_v44, %v256_v43  ;;  %v241_v48 = vld [vmem:[%s1169_s24 + $0x78] sm:$0xff]  ;;  %v194_v50 = vld [vmem:[#allocation5] sm:$0xff] }
  0x67   : > { %711 = vmatpush3.bf16.msra.mxu0 %v710_v19  ;;  %742 = vmatpush3.bf16.msra.mxu1 %v710_v19  ;;  %v726_v45 = vpack.c.bf16 %v239_v42, %v238_v41  ;;  %v730_v49 = vpack.c.bf16 %v241_v48, %v240_v47  ;;  %v210_v51 = vld [vmem:[#allocation5 + $0x80] sm:$0xff]  ;;  %v197_v52 = vld [vmem:[#allocation5 + $0x18] sm:$0xff]  ;;  %v196_v54 = vld [vmem:[#allocation5 + $0x10] sm:$0xff] }
  0x68   : > { %713 = vmatprep.subr.bf16.mxu0 %v712_v20  ;;  %735 = vmatprep.subr.bf16.mxu1 %v712_v20  ;;  %v213_v53 = vld [vmem:[#allocation5 + $0x98] sm:$0xff]  ;;  %v212_v55 = vld [vmem:[#allocation5 + $0x90] sm:$0xff]  ;;  %v199_v56 = vld [vmem:[#allocation5 + $0x28] sm:$0xff] }
  0x69   : > { %v215_v57 = vld [vmem:[#allocation5 + $0xa8] sm:$0xff]  ;;  %v198_v58 = vld [vmem:[#allocation5 + $0x20] sm:$0xff]  ;;  %v201_v60 = vld [vmem:[#allocation5 + $0x38] sm:$0xff] }
  0x6a   : > { %v214_v59 = vld [vmem:[#allocation5 + $0xa0] sm:$0xff]  ;;  %v217_v61 = vld [vmem:[#allocation5 + $0xb8] sm:$0xff]  ;;  %v200_v62 = vld [vmem:[#allocation5 + $0x30] sm:$0xff] }
  0x6b   : > { %715 = vmatpush3.bf16.msra.mxu0 %v714_v27  ;;  %743 = vmatpush3.bf16.msra.mxu1 %v714_v27  ;;  %v216_v63 = vld [vmem:[#allocation5 + $0xb0] sm:$0xff]  ;;  %v203_v0 = vld [vmem:[#allocation5 + $0x48] sm:$0xff]  ;;  %v202_v2 = vld [vmem:[#allocation5 + $0x40] sm:$0xff] }
  0x6c   : > { %717 = vmatprep.subr.bf16.mxu0 %v716_v28  ;;  %736 = vmatprep.subr.bf16.mxu1 %v716_v28  ;;  %v219_v1 = vld [vmem:[#allocation5 + $0xc8] sm:$0xff]  ;;  %v218_v3 = vld [vmem:[#allocation5 + $0xc0] sm:$0xff]  ;;  %v205_v4 = vld [vmem:[#allocation5 + $0x58] sm:$0xff] }
  0x6d   : > { %v221_v5 = vld [vmem:[#allocation5 + $0xd8] sm:$0xff]  ;;  %v204_v6 = vld [vmem:[#allocation5 + $0x50] sm:$0xff]  ;;  %v207_v8 = vld [vmem:[#allocation5 + $0x68] sm:$0xff] }
  0x6e   : > { %v220_v7 = vld [vmem:[#allocation5 + $0xd0] sm:$0xff]  ;;  %v223_v9 = vld [vmem:[#allocation5 + $0xe8] sm:$0xff]  ;;  %v206_v10 = vld [vmem:[#allocation5 + $0x60] sm:$0xff] }
  0x6f   : > { %719 = vmatpush3.bf16.msra.mxu0 %v718_v33  ;;  %744 = vmatpush3.bf16.msra.mxu1 %v718_v33  ;;  %v222_v11 = vld [vmem:[#allocation5 + $0xe0] sm:$0xff]  ;;  %v209_v12 = vld [vmem:[#allocation5 + $0x78] sm:$0xff]  ;;  %v208_v14 = vld [vmem:[#allocation5 + $0x70] sm:$0xff] }
  0x70   : > { %721 = vmatprep.subr.bf16.mxu0 %v720_v34  ;;  %737 = vmatprep.subr.bf16.mxu1 %v720_v34  ;;  %v225_v13 = vld [vmem:[#allocation5 + $0xf8] sm:$0xff]  ;;  %v224_v15 = vld [vmem:[#allocation5 + $0xf0] sm:$0xff] }
  0x73   : > { %723 = vmatpush3.bf16.msra.mxu0 %v722_v39  ;;  %745 = vmatpush3.bf16.msra.mxu1 %v722_v39 }
  0x74   : > { %725 = vmatprep.subr.bf16.mxu0 %v724_v40  ;;  %738 = vmatprep.subr.bf16.mxu1 %v724_v40 }
  0x77   : > { %727 = vmatpush3.bf16.msra.mxu0 %v726_v45  ;;  %746 = vmatpush3.bf16.msra.mxu1 %v726_v45 }
  0x78   : > { %729 = vmatprep.subr.bf16.mxu0 %v728_v46  ;;  %739 = vmatprep.subr.bf16.mxu1 %v728_v46 }
  0x7b   : > { %731 = vmatpush3.bf16.msra.mxu0 %v730_v49  ;;  %747 = vmatpush3.bf16.msra.mxu1 %v730_v49 }
  0x7e   : > { %323 = vmatmul.mubr.f32.vlgmr.msra.gmra.mrb[0].mxu0 %v194_v50  ;;  %363 = vmatmul.mubr.f32.vlgmr.msra.gmra.mrb[0].mxu1 %v210_v51 }
  0x7f   : > { %327 = vmatprep.mubr.f32.mxu0 %v197_v52  ;;  %367 = vmatprep.mubr.f32.mxu1 %v213_v53 }
  0x82   : > { %328 = vmatmul.mubr.f32.gmra.mrb[2].mxu0 %v196_v54  ;;  %368 = vmatmul.mubr.f32.gmra.mrb[2].mxu1 %v212_v55 }
  0x83   : > { %332 = vmatprep.mubr.f32.mxu0 %v199_v56  ;;  %372 = vmatprep.mubr.f32.mxu1 %v215_v57 }
  0x86   : > { %333 = vmatmul.mubr.f32.gmra.mrb[4].mxu0 %v198_v58  ;;  %373 = vmatmul.mubr.f32.gmra.mrb[4].mxu1 %v214_v59 }
  0x87   : > { %337 = vmatprep.mubr.f32.mxu0 %v201_v60  ;;  %377 = vmatprep.mubr.f32.mxu1 %v217_v61 }
  0x8a   : > { %338 = vmatmul.mubr.f32.gmra.mrb[6].mxu0 %v200_v62  ;;  %378 = vmatmul.mubr.f32.gmra.mrb[6].mxu1 %v216_v63 }
  0x8b   : > { %342 = vmatprep.mubr.f32.mxu0 %v203_v0  ;;  %382 = vmatprep.mubr.f32.mxu1 %v219_v1 }
  0x8e   : > { %343 = vmatmul.mubr.f32.gmra.mrb[8].mxu0 %v202_v2  ;;  %383 = vmatmul.mubr.f32.gmra.mrb[8].mxu1 %v218_v3 }
  0x8f   : > { %347 = vmatprep.mubr.f32.mxu0 %v205_v4  ;;  %387 = vmatprep.mubr.f32.mxu1 %v221_v5 }
  0x92   : > { %348 = vmatmul.mubr.f32.gmra.mrb[10].mxu0 %v204_v6  ;;  %388 = vmatmul.mubr.f32.gmra.mrb[10].mxu1 %v220_v7 }
  0x93   : > { %352 = vmatprep.mubr.f32.mxu0 %v207_v8  ;;  %392 = vmatprep.mubr.f32.mxu1 %v223_v9 }
  0x96   : > { %353 = vmatmul.mubr.f32.gmra.mrb[12].mxu0 %v206_v10  ;;  %393 = vmatmul.mubr.f32.gmra.mrb[12].mxu1 %v222_v11 }
  0x97   : > { %357 = vmatprep.mubr.f32.mxu0 %v209_v12  ;;  %397 = vmatprep.mubr.f32.mxu1 %v225_v13 }
  0x9a   : > { %358 = vmatmul.mubr.f32.gmra.mrb[14].mxu0 %v208_v14  ;;  %398 = vmatmul.mubr.f32.gmra.mrb[14].mxu1 %v224_v15 }
 0x151   : > { %v652_v16 = vpop.f32.mrb[0].mxu0  ;;  %v676_v17 = vpop.f32.mrb[0].mxu1 }
 0x152   : > { %v653_v18 = vpop.f32.mrb[1].mxu0  ;;  %v677_v19 = vpop.f32.mrb[1].mxu1 }
 0x153   : > { %v654_v20 = vadd.f32 %v653_v18, %v652_v16  ;;  %v678_v21 = vadd.f32 %v677_v19, %v676_v17 }
 0x155   : > { %v403_v22 = vmul.f32 %v654_v20, %v654_v20  ;;  %v411_v23 = vmul.f32 %v678_v21, %v678_v21  ;;  %v655_v24 = vpop.f32.mrb[2].mxu0  ;;  %v679_v25 = vpop.f32.mrb[2].mxu1 }
 0x156   : > { %v656_v26 = vpop.f32.mrb[3].mxu0  ;;  %v680_v27 = vpop.f32.mrb[3].mxu1 }
 0x157   : > { %v419_v28 = vadd.f32 %v411_v23, %v403_v22  ;;  %v657_v29 = vadd.f32 %v656_v26, %v655_v24  ;;  %v681_v30 = vadd.f32 %v680_v27, %v679_v25 }
 0x159   : > { %827 = vrsqrt.f32 %v419_v28  ;;  %v658_v31 = vpop.f32.mrb[4].mxu0  ;;  %v682_v32 = vpop.f32.mrb[4].mxu1  ;;  %v404_v33 = vmul.f32 %v657_v29, %v657_v29  ;;  %v412_v34 = vmul.f32 %v681_v30, %v681_v30  ;;  %vm429_vm0 = vcmp.eq.f32.partialorder %v419_v28, inf }
 0x15a   : > { %v659_v35 = vpop.f32.mrb[5].mxu0  ;;  %v683_v36 = vpop.f32.mrb[5].mxu1  ;;  %v432_v60 = vand.u32 2147483648, %v419_v28  ;;  %vm431_vm1 = vcmp.eq.f32.partialorder %v419_v28, 0.0 }
 0x15b   : > { %v660_v37 = vadd.f32 %v659_v35, %v658_v31  ;;  %v684_v38 = vadd.f32 %v683_v36, %v682_v32  ;;  %v420_v39 = vadd.f32 %v412_v34, %v404_v33 }
 0x15d   : > { %v405_v40 = vmul.f32 %v660_v37, %v660_v37  ;;  %v413_v41 = vmul.f32 %v684_v38, %v684_v38  ;;  %v661_v42 = vpop.f32.mrb[6].mxu0  ;;  %v685_v43 = vpop.f32.mrb[6].mxu1  ;;  %829 = vrsqrt.f32 %v420_v39  ;;  %vm436_vm2 = vcmp.eq.f32.partialorder %v420_v39, inf }
 0x15e   : > { %v662_v44 = vpop.f32.mrb[7].mxu0  ;;  %v686_v45 = vpop.f32.mrb[7].mxu1  ;;  %v439_v12 = vand.u32 2147483648, %v420_v39  ;;  %vm438_vm3 = vcmp.eq.f32.partialorder %v420_v39, 0.0 }
 0x15f   : > { %v1211_v46 = vadd.f32 %v413_v41, %v405_v40  ;;  %v663_v47 = vadd.f32 %v662_v44, %v661_v42  ;;  %v687_v48 = vadd.f32 %v686_v45, %v685_v43 }
 0x161   : > { %831 = vrsqrt.f32 %v1211_v46  ;;  %v664_v49 = vpop.f32.mrb[8].mxu0  ;;  %v688_v50 = vpop.f32.mrb[8].mxu1  ;;  %v406_v51 = vmul.f32 %v663_v47, %v663_v47  ;;  %v414_v52 = vmul.f32 %v687_v48, %v687_v48  ;;  %vm443_vm4 = vcmp.eq.f32.partialorder %v1211_v46, inf }
 0x162   : > { %v665_v53 = vpop.f32.mrb[9].mxu0  ;;  %v689_v54 = vpop.f32.mrb[9].mxu1  ;;  %v446_v24 = vand.u32 2147483648, %v1211_v46  ;;  %vm445_vm5 = vcmp.eq.f32.partialorder %v1211_v46, 0.0 }
 0x163   : > { %v828_v55 = vpop.eup %827  ;;  %v666_v56 = vadd.f32 %v665_v53, %v664_v49  ;;  %v690_v57 = vadd.f32 %v689_v54, %v688_v50  ;;  %v1215_v59 = vadd.f32 %v414_v52, %v406_v51 }
 0x164   : > { %v428_v58 = vmul.f32 %v828_v55, %v419_v28 }
 0x165   : > { %v407_v61 = vmul.f32 %v666_v56, %v666_v56  ;;  %v415_v62 = vmul.f32 %v690_v57, %v690_v57  ;;  %v667_v63 = vpop.f32.mrb[10].mxu0  ;;  %v691_v0 = vpop.f32.mrb[10].mxu1  ;;  %833 = vrsqrt.f32 %v1215_v59  ;;  %vm450_vm6 = vcmp.eq.f32.partialorder %v1215_v59, inf }
 0x166   : > { %v430_v1 = vsel %vm429_vm0, %v419_v28, %v428_v58  ;;  %v668_v2 = vpop.f32.mrb[11].mxu0  ;;  %v692_v3 = vpop.f32.mrb[11].mxu1  ;;  %v453_v38 = vand.u32 2147483648, %v1215_v59  ;;  %vm452_vm7 = vcmp.eq.f32.partialorder %v1215_v59, 0.0 }
 0x167   : > { %v433_v4 = vsel %vm431_vm1, %v432_v60, %v430_v1  ;;  %v423_v5 = vadd.f32 %v415_v62, %v407_v61  ;;  %v669_v6 = vadd.f32 %v668_v2, %v667_v63  ;;  %v830_v7 = vpop.eup %829  ;;  %v693_v8 = vadd.f32 %v692_v3, %v691_v0 }
 0x168   : > { %483 = vst [vmem:[%s1218_s19] sm:$0xff] %v433_v4  ;;  %v435_v9 = vmul.f32 %v830_v7, %v420_v39 }
 0x169   : > { %835 = vrsqrt.f32 %v423_v5  ;;  %v670_v10 = vpop.f32.mrb[12].mxu0  ;;  %v694_v11 = vpop.f32.mrb[12].mxu1  ;;  %v408_v13 = vmul.f32 %v669_v6, %v669_v6  ;;  %v416_v14 = vmul.f32 %v693_v8, %v693_v8  ;;  %vm457_vm8 = vcmp.eq.f32.partialorder %v423_v5, inf }
 0x16a   : > { %v671_v15 = vpop.f32.mrb[13].mxu0  ;;  %v695_v16 = vpop.f32.mrb[13].mxu1  ;;  %v437_v18 = vsel %vm436_vm2, %v420_v39, %v435_v9  ;;  %vm459_vm9 = vcmp.eq.f32.partialorder %v423_v5, 0.0 }
 0x16b   : > { %v832_v17 = vpop.eup %831  ;;  %v672_v19 = vadd.f32 %v671_v15, %v670_v10  ;;  %v696_v20 = vadd.f32 %v695_v16, %v694_v11  ;;  %v440_v21 = vsel %vm438_vm3, %v439_v12, %v437_v18  ;;  %v424_v23 = vadd.f32 %v416_v14, %v408_v13 }
 0x16c   : > { %v442_v22 = vmul.f32 %v832_v17, %v1211_v46  ;;  %484 = vst [vmem:[%s1218_s19 + $0x8] sm:$0xff] %v440_v21 }
 0x16d   : > { %v409_v25 = vmul.f32 %v672_v19, %v672_v19  ;;  %v417_v26 = vmul.f32 %v696_v20, %v696_v20  ;;  %v673_v27 = vpop.f32.mrb[14].mxu0  ;;  %v697_v28 = vpop.f32.mrb[14].mxu1  ;;  %837 = vrsqrt.f32 %v424_v23  ;;  %vm464_vm10 = vcmp.eq.f32.partialorder %v424_v23, inf }
 0x16e   : > { %v444_v29 = vsel %vm443_vm4, %v1211_v46, %v442_v22  ;;  %v674_v30 = vpop.f32.mrb[15].mxu0  ;;  %v698_v31 = vpop.f32.mrb[15].mxu1  ;;  %v460_v46 = vand.u32 2147483648, %v423_v5  ;;  %v467_v51 = vand.u32 2147483648, %v424_v23  ;;  %vm466_vm11 = vcmp.eq.f32.partialorder %v424_v23, 0.0 }
 0x16f   : > { %v447_v32 = vsel %vm445_vm5, %v446_v24, %v444_v29  ;;  %v425_v33 = vadd.f32 %v417_v26, %v409_v25  ;;  %v675_v34 = vadd.f32 %v674_v30, %v673_v27  ;;  %v834_v35 = vpop.eup %833  ;;  %v699_v36 = vadd.f32 %v698_v31, %v697_v28 }
 0x170   : > { %485 = vst [vmem:[%s1218_s19 + $0x10] sm:$0xff] %v447_v32  ;;  %v449_v37 = vmul.f32 %v834_v35, %v1215_v59 }
 0x171   : > { %839 = vrsqrt.f32 %v425_v33  ;;  %v410_v39 = vmul.f32 %v675_v34, %v675_v34  ;;  %v418_v40 = vmul.f32 %v699_v36, %v699_v36  ;;  %vm471_vm12 = vcmp.eq.f32.partialorder %v425_v33, inf }
 0x172   : > { %v451_v42 = vsel %vm450_vm6, %v1215_v59, %v449_v37  ;;  %v474_v56 = vand.u32 2147483648, %v425_v33  ;;  %vm473_vm13 = vcmp.eq.f32.partialorder %v425_v33, 0.0 }
 0x173   : > { %v836_v41 = vpop.eup %835  ;;  %v454_v43 = vsel %vm452_vm7, %v453_v38, %v451_v42  ;;  %v426_v45 = vadd.f32 %v418_v40, %v410_v39 }
 0x174   : > { %v456_v44 = vmul.f32 %v836_v41, %v423_v5  ;;  %486 = vst [vmem:[%s1218_s19 + $0x18] sm:$0xff] %v454_v43 }
 0x175   : > { %841 = vrsqrt.f32 %v426_v45  ;;  %vm478_vm14 = vcmp.eq.f32.partialorder %v426_v45, inf  ;;  %v481_v61 = vand.u32 2147483648, %v426_v45  ;;  %vm480_vm15 = vcmp.eq.f32.partialorder %v426_v45, 0.0 }
 0x176   : > { %v458_v47 = vsel %vm457_vm8, %v423_v5, %v456_v44 }
 0x177   : > { %v461_v48 = vsel %vm459_vm9, %v460_v46, %v458_v47  ;;  %v838_v49 = vpop.eup %837 }
 0x178   : > { %487 = vst [vmem:[%s1218_s19 + $0x20] sm:$0xff] %v461_v48  ;;  %v463_v50 = vmul.f32 %v838_v49, %v424_v23 }
 0x17a   : > { %v465_v53 = vsel %vm464_vm10, %v424_v23, %v463_v50 }
 0x17b   : > { %v840_v52 = vpop.eup %839  ;;  %v468_v54 = vsel %vm466_vm11, %v467_v51, %v465_v53 }
 0x17c   : > { %v470_v55 = vmul.f32 %v840_v52, %v425_v33  ;;  %488 = vst [vmem:[%s1218_s19 + $0x28] sm:$0xff] %v468_v54 }
 0x17e   : > { %v472_v57 = vsel %vm471_vm12, %v425_v33, %v470_v55 }
 0x17f   : > { %v475_v58 = vsel %vm473_vm13, %v474_v56, %v472_v57  ;;  %v842_v59 = vpop.eup %841 }
 0x180   : > { %489 = vst [vmem:[%s1218_s19 + $0x30] sm:$0xff] %v475_v58  ;;  %v477_v60 = vmul.f32 %v842_v59, %v426_v45 }
 0x182   : > { %v479_v62 = vsel %vm478_vm14, %v426_v45, %v477_v60 }
 0x183   : > { %v482_v63 = vsel %vm480_vm15, %v481_v61, %v479_v62 }
 0x184   : > { %490 = vst [vmem:[%s1218_s19 + $0x38] sm:$0xff] %v482_v63 }
 0x185   : > { %914 = shalt.err (!%p911_p5)
}
 0x186   : > { %s915_s3 = scalar_lea.hbm %s1242_s7, 1024  ;;  %s919_s16 = scalar_lea.hbm %s1296_s2, 2048 }
 0x187   : > { %p916_p9 = scmp.ne.s32.totalorder %s1242_s7, %s915_s3  ;;  %p920_p3 = scmp.lt.u32.totalorder %s1242_s7, %s1296_s2 }
 0x188   : > { %p921_p7 = scmp.lt.u32.totalorder %s919_s16, %s915_s3  ;;  %p923_p4 = scmp.lt.u32.totalorder %s915_s3, %s1242_s7 }
 0x189   : > { %p917_p1 = pnand %p916_p9, %p1109_p10 }
 0x18a   : > { %p922_p13 = por %p921_p7, %p920_p3 }
 0x18b   : > { %p918_p2 = pneg %p917_p1 }
 0x18c   : > { %p924_p6 = por %p923_p4, %p922_p13 }
 0x18e   : > { %p925_p8 = pnand %p924_p6, %p918_p2 }
 0x190   : > { %928 = shalt.err (!%p925_p8)
}
 0x191   : > { %s996_s17 = smov 128   ;;  %s997_s19 = smov 8  }
 0x192   : > { %754 = dma.vmem_to_hbm [thread:$0]  (%p1109_p10), %s1244_s4, 1024, %s1242_s7, %s492_s12, %s996_s17, %s996_s17, %s997_s19  }
 0x193 PF: > { %s521_s21 = sand.u32 1, %s967_s9   ;;  %p1314_p12 = scmp.ne.s32.totalorder %s1304_s20, 0 }
 0x194   : > { %p1315_p11 = scmp.ge.s32.totalorder %s987_s14, 2  ;;  %s522_s5 = scalar_lea.sflag [#allocation4], %s521_s21 }
 0x196   : > { %p765_p0 = pnand %p1315_p11, %p1314_p12 }
 0x198   : > { %962 = dma.done.wait (!%p765_p0), %s522_s5, 1024  }
 0x199   : > { %964 = vsyncadd (!%p765_p0), %s522_s5, 4294966272  ;;  %s19_s14 = sadd.s32 1, %s987_s14   ;;  %s1316_s9 = smov %s971_s10 }
 0x19a   : > { %p16_p5 = scmp.ge.s32.totalorder %s19_s14, 4   ;;  %s1317_s10 = smov %s975_s11 }
 0x19b   : > { %s1318_s11 = smov %s1118_s28  ;;  %s1319_s12 = smov %s983_s13 }
 0x19c   : > { %s1320_s13 = smov %s1322_s25  ;;  %18 = sbr.rel (!%p16_p5) target bundleno = 7 (0x7), region = 77 }
 0x1a3   :  { %527 = vsyncpa [#allocation3], 1 }
 0x1a4   :  { %529 = vsyncpa [#allocation3 + $0x1], 1 }
 0x1a5   :  { %530 = vsyncpa [#allocation6], 1 }
 0x1a6   :  { %531 = vsyncpa [#allocation4], 1 }
 0x1a7   :  { %533 = vsyncpa [#allocation4 + $0x1], 1 }

</bundles_post_ra>
